<compile_context>
chip_gen: v5e
topology: v5e:2x2
jax: 0.10.0
libtpu: 0.0.40
codegen_flags: <defaults>
</compile_context>

<pallas_src>
import functools

import jax
import jax.numpy as jnp
from jax.experimental import pallas as pl
from jax.experimental.pallas import tpu as pltpu


# --------------------------------------------------------------------------
# VMEM budget / tiling helpers
# --------------------------------------------------------------------------
def _vmem_limit_bytes():
    """Generation-aware scoped-VMEM budget (half of physical, capped)."""
    cap = 64 * 1024 * 1024
    try:
        info = pltpu.get_tpu_info()
        cap = int(getattr(info, "vmem_capacity_bytes", cap))
    except Exception:
        pass
    # v5e/v6e: 128 MiB physical -> 64 MiB budget; v7x: 64 MiB -> 32 MiB.
    return max(16 * 1024 * 1024, min(cap // 2, 64 * 1024 * 1024))


def _pick_lane_tile(hw, max_tile):
    """Largest multiple of 128 (<= max_tile) dividing hw, else full hw."""
    if hw % 128 != 0 or hw <= max_tile:
        return hw                       # full-extent block is always legal
    t = max(128, max_tile - (max_tile % 128))
    while hw % t != 0:
        t -= 128
    return t


def _pick_batch_block(n, c, thw, itemsize, target_bytes, max_bn=None):
    """Largest divisor of n keeping a (bN, C, thw) block near target_bytes."""
    per_n = max(1, c * thw * itemsize)
    bn = max(1, min(n, target_bytes // per_n))
    if max_bn is not None:
        bn = max(1, min(bn, int(max_bn)))
    bn = int(bn)
    while n % bn != 0:
        bn -= 1
    return bn


# --------------------------------------------------------------------------
# Fused kernel: stats + running-buffer update + folded affine apply.
# Used whenever x fits comfortably in VMEM (always true for NET1 layers).
# --------------------------------------------------------------------------
def _bn2d_fused_kernel(x_ref, mu_ref, var_ref, gamma_ref, beta_ref,
                       y_ref, new_mu_ref, new_var_ref,
                       *, inv_t, inv_m, inv_m1, eps, on):
    xf = x_ref[...].astype(jnp.float32)                  # (N, C, HW)

    if on:
        # Per-channel sums: elementwise (VPU) add over N, one cross-lane reduce.
        col = jnp.sum(xf, axis=0)                        # (C, HW)
        s = jnp.sum(col, axis=1, keepdims=True)          # (C, 1)
        mean = s * jnp.float32(inv_m)
        # Subtract-mean-first unbiased variance (x is resident, so the extra
        # VPU pass is free and avoids E[x^2]-E[x]^2 cancellation).
        d = xf - mean[None, :, :]
        dcol = jnp.sum(d * d, axis=0)                    # (C, HW)
        ss = jnp.sum(dcol, axis=1, keepdims=True)        # (C, 1)
        var_b = ss * jnp.float32(inv_m1)
        new_mu = mu_ref[...] + (mean - mu_ref[...]) * jnp.float32(inv_t)
        new_var = var_ref[...] + (var_b - var_ref[...]) * jnp.float32(inv_t)
    else:
        new_mu = mu_ref[...]
        new_var = var_ref[...]

    new_mu_ref[...] = new_mu
    new_var_ref[...] = new_var

    # Fold affine + rsqrt into per-channel scale/shift (rsqrt -> EUP slot).
    scale = gamma_ref[...] * jax.lax.rsqrt(new_var + jnp.float32(eps))  # (C,1)
    shift = beta_ref[...] - new_mu * scale                              # (C,1)
    y_ref[...] = (xf * scale[None, :, :] + shift[None, :, :]).astype(y_ref.dtype)


# --------------------------------------------------------------------------
# Streaming fallback kernels (x larger than the VMEM budget).
# --------------------------------------------------------------------------
def _bn2d_stats_kernel(x_ref, mu_ref, var_ref,
                       new_mu_ref, new_var_ref,
                       sum_sc, sq_sc,
                       *, inv_t, inv_m, inv_m1):
    """Pass 1: accumulate per-channel sum / sumsq, finalize running stats."""
    n = pl.program_id(0)
    h = pl.program_id(1)

    @pl.when(jnp.logical_and(n == 0, h == 0))
    def _init():
        sum_sc[...] = jnp.zeros_like(sum_sc)
        sq_sc[...] = jnp.zeros_like(sq_sc)

    x = x_ref[...].astype(jnp.float32)                   # (bN, C, tHW)
    # Reduce over the batch sub-block *before* touching scratch so the two
    # scratch stores are amortized over bN input vregs (v5e has one vst slot).
    sum_sc[...] += jnp.sum(x, axis=0)
    sq_sc[...] += jnp.sum(x * x, axis=0)

    @pl.when(jnp.logical_and(n == pl.num_programs(0) - 1,
                             h == pl.num_programs(1) - 1))
    def _finalize():
        s = jnp.sum(sum_sc[...], axis=1, keepdims=True)   # (C, 1)
        ss = jnp.sum(sq_sc[...], axis=1, keepdims=True)   # (C, 1)
        mean = s * jnp.float32(inv_m)
        var_b = (ss - s * mean) * jnp.float32(inv_m1)     # unbiased
        new_mu_ref[...] = mu_ref[...] + (mean - mu_ref[...]) * jnp.float32(inv_t)
        new_var_ref[...] = var_ref[...] + (var_b - var_ref[...]) * jnp.float32(inv_t)


def _bn2d_apply_kernel(mu_ref, var_ref, gamma_ref, beta_ref, x_ref, y_ref,
                       *, eps):
    """Pass 2: y = x*scale + shift; scale/shift derived in-kernel (tiny)."""
    scale = gamma_ref[...] * jax.lax.rsqrt(var_ref[...] + jnp.float32(eps))
    shift = beta_ref[...] - mu_ref[...] * scale
    x = x_ref[...].astype(jnp.float32)                    # (bN, C, tHW)
    y_ref[...] = (x * scale[None, :, :] + shift[None, :, :]).astype(y_ref.dtype)


# --------------------------------------------------------------------------
# Wrapper
# --------------------------------------------------------------------------
def batchnorm2d_forward(x, mu, var, gamma, beta, *, t=1, eps=1e-5, on=True,
                        force_streaming=False, max_lane_tile=None,
                        max_batch_block=None):
    """Forward pass of batchnorm2d.

    Args:
      x:     (N, C, H, W) activations (NCHW, matching the PyTorch module)
      mu:    (C,)  running mean buffer
      var:   (C,)  running var buffer
      gamma: (C, 1, 1) scale parameter
      beta:  (C, 1, 1) shift parameter
      t:     step counter (Python int, as in the module)
      on:    whether the running-stat update is enabled

    Returns:
      y (N, C, H, W) in x.dtype, new_mu (C,), new_var (C,)
    """
    N, C, H, W = x.shape
    HW = H * W
    M = N * HW
    itemsize = x.dtype.itemsize

    # Layout-preserving view; no HBM transpose passes.
    x3 = x.reshape(N, C, HW)
    mu_c = mu.reshape(C, 1).astype(jnp.float32)
    var_c = var.reshape(C, 1).astype(jnp.float32)
    gamma_c = gamma.reshape(C, 1).astype(jnp.float32)
    beta_c = beta.reshape(C, 1).astype(jnp.float32)

    inv_t = 1.0 / float(t)
    inv_m = 1.0 / float(M)
    inv_m1 = 1.0 / float(max(M - 1, 1))   # clamp degenerate M==1 (no silent NaN)

    vmem_limit = _vmem_limit_bytes()

    # ---------------- fused single-kernel path ----------------
    x_bytes = x.size * itemsize
    f32_bytes = x.size * 4
    fused_est = 2 * x_bytes + 3 * f32_bytes   # in + out + f32 temporaries
    use_fused = (not force_streaming) and fused_est <= (vmem_limit * 3) // 4

    if use_fused:
        kernel = functools.partial(
            _bn2d_fused_kernel, inv_t=inv_t, inv_m=inv_m, inv_m1=inv_m1,
            eps=float(eps), on=bool(on))
        cvec = pl.BlockSpec((C, 1), lambda i: (0, 0))
        y3, new_mu, new_var = pl.pallas_call(
            kernel,
            out_shape=(
                jax.ShapeDtypeStruct((N, C, HW), x.dtype),
                jax.ShapeDtypeStruct((C, 1), jnp.float32),
                jax.ShapeDtypeStruct((C, 1), jnp.float32),
            ),
            grid=(1,),
            in_specs=[
                pl.BlockSpec((N, C, HW), lambda i: (0, 0, 0)),
                cvec, cvec, cvec, cvec,
            ],
            out_specs=(
                pl.BlockSpec((N, C, HW), lambda i: (0, 0, 0)),
                cvec, cvec,
            ),
            compiler_params=pltpu.CompilerParams(
                dimension_semantics=("arbitrary",),
                vmem_limit_bytes=vmem_limit),
        )(x3, mu_c, var_c, gamma_c, beta_c)
        return y3.reshape(N, C, H, W), new_mu.reshape(C), new_var.reshape(C)

    # ---------------- streaming two-pass fallback ----------------
    target_block_bytes = min(2 * 1024 * 1024, vmem_limit // 8)
    if max_lane_tile is None:
        cap_scratch = (vmem_limit // 4) // max(1, 8 * C)   # 2 f32 (C,thw) bufs
        cap_block = (2 * target_block_bytes) // max(1, C * itemsize)
        max_lane_tile = max(128, min(cap_scratch, cap_block))
    thw = _pick_lane_tile(HW, max_lane_tile)
    n_hw = HW // thw
    bN = _pick_batch_block(N, C, thw, itemsize, target_block_bytes,
                           max_batch_block)
    n_bn = N // bN

    cvec2 = pl.BlockSpec((C, 1), lambda n, h: (0, 0))
    xblk = pl.BlockSpec((bN, C, thw), lambda n, h: (n, 0, h))

    if on:
        stats_kernel = functools.partial(
            _bn2d_stats_kernel, inv_t=inv_t, inv_m=inv_m, inv_m1=inv_m1)
        new_mu, new_var = pl.pallas_call(
            stats_kernel,
            out_shape=(
                jax.ShapeDtypeStruct((C, 1), jnp.float32),
                jax.ShapeDtypeStruct((C, 1), jnp.float32),
            ),
            grid=(n_bn, n_hw),
            in_specs=[xblk, cvec2, cvec2],
            out_specs=(cvec2, cvec2),
            scratch_shapes=[
                pltpu.VMEM((C, thw), jnp.float32),   # running sum
                pltpu.VMEM((C, thw), jnp.float32),   # running sum of squares
            ],
            compiler_params=pltpu.CompilerParams(
                dimension_semantics=("arbitrary", "arbitrary"),
                vmem_limit_bytes=vmem_limit),
        )(x3, mu_c, var_c)
    else:
        new_mu, new_var = mu_c, var_c

    apply_kernel = functools.partial(_bn2d_apply_kernel, eps=float(eps))
    y3 = pl.pallas_call(
        apply_kernel,
        out_shape=jax.ShapeDtypeStruct((N, C, HW), x.dtype),
        grid=(n_bn, n_hw),
        in_specs=[cvec2, cvec2, cvec2, cvec2, xblk],
        out_specs=xblk,
        compiler_params=pltpu.CompilerParams(
            dimension_semantics=("parallel", "parallel"),
            vmem_limit_bytes=vmem_limit),
    )(new_mu, new_var, gamma_c, beta_c, x3)

    return y3.reshape(N, C, H, W), new_mu.reshape(C), new_var.reshape(C)


# --------------------------------------------------------------------------
# Pure-JAX reference mirroring the PyTorch module exactly.
# --------------------------------------------------------------------------
def _reference_forward(x, mu, var, gamma, beta, t=1, eps=1e-5, on=True):
    if on:
        mean = jnp.mean(x, axis=(0, 2, 3))
        n = x.shape[0] * x.shape[2] * x.shape[3]
        var_b = jnp.sum((x - mean[None, :, None, None]) ** 2,
                        axis=(0, 2, 3)) / (n - 1)
        mu = mu + (mean - mu) / t
        var = var + (var_b - var) / t
    mu_e = mu[None, :, None, None]
    var_e = var[None, :, None, None]
    x_hat = (x - mu_e) / jnp.sqrt(var_e + eps)
    y = x_hat * gamma[None, :, :, :] + beta[None, :, :, :]
    return y, mu, var


if __name__ == "__main__":
    key = jax.random.PRNGKey(0)
    k_x, k_mu, k_xs = jax.random.split(key, 3)

    # ---- fused path: NET1-sized feature map, training mode (on=True) -------
    N, C, H, W = 2, 4, 16, 16
    x = jax.random.normal(k_x, (N, C, H, W), dtype=jnp.float32) * 2.0 + 0.5

    mu0 = jnp.zeros((C,), jnp.float32)          # register_buffer('mu', zeros)
    var0 = jnp.zeros((C,), jnp.float32)         # register_buffer('var', zeros)
    gamma = jnp.ones((C, 1, 1), jnp.float32)    # nn.Parameter(ones((dim,1,1)))
    beta = jnp.zeros((C, 1, 1), jnp.float32)    # nn.Parameter(zeros((dim,1,1)))

    y, mu1, var1 = batchnorm2d_forward(x, mu0, var0, gamma, beta,
                                       t=1, eps=1e-5, on=True)
    y = jax.block_until_ready(y)
    y_ref, mu_ref, var_ref = _reference_forward(x, mu0, var0, gamma, beta,
                                                t=1, eps=1e-5, on=True)
    assert jnp.allclose(y, y_ref, atol=1e-4, rtol=1e-4)
    assert jnp.allclose(mu1, mu_ref, atol=1e-5, rtol=1e-5)
    assert jnp.allclose(var1, var_ref, atol=1e-5, rtol=1e-5)

    # ---- fused path: eval mode (on=False) -----------------------------------
    y2, mu2, var2 = batchnorm2d_forward(x, mu1, var1, gamma, beta,
                                        t=2, eps=1e-5, on=False)
    y2 = jax.block_until_ready(y2)
    y2_ref, _, _ = _reference_forward(x, mu_ref, var_ref, gamma, beta,
                                      t=2, eps=1e-5, on=False)
    assert jnp.allclose(y2, y2_ref, atol=1e-4, rtol=1e-4)
    assert jnp.allclose(mu2, mu1)
    assert jnp.allclose(var2, var1)

    # ---- streaming fallback path (forced; tiny tiles exercise the full grid)
    Ns, Cs, Hs, Ws = 4, 8, 16, 16
    xs = jax.random.normal(k_xs, (Ns, Cs, Hs, Ws), dtype=jnp.float32) * 1.5 - 0.3
    mus = jax.random.normal(k_mu, (Cs,), dtype=jnp.float32) * 0.1
    vars0 = jnp.abs(jax.random.normal(k_mu, (Cs,), dtype=jnp.float32)) + 0.5
    gammas = jnp.full((Cs, 1, 1), 1.5, jnp.float32)
    betas = jnp.full((Cs, 1, 1), -0.25, jnp.float32)

    ys, mus1, vars1 = batchnorm2d_forward(
        xs, mus, vars0, gammas, betas, t=3, eps=1e-5, on=True,
        force_streaming=True, max_lane_tile=128, max_batch_block=2)
    ys = jax.block_until_ready(ys)
    ys_ref, mus_ref, vars_ref = _reference_forward(
        xs, mus, vars0, gammas, betas, t=3, eps=1e-5, on=True)
    assert jnp.allclose(ys, ys_ref, atol=1e-4, rtol=1e-4)
    assert jnp.allclose(mus1, mus_ref, atol=1e-5, rtol=1e-5)
    assert jnp.allclose(vars1, vars_ref, atol=1e-4, rtol=1e-4)

    print("KERNEL_OK")
</pallas_src>

<mosaic_0001>
module attributes {stable_mosaic.version = 11 : i64} {
  func.func @_bn2d_fused_kernel(%arg0: i32, %arg1: memref<2x4x256xf32, #tpu.memory_space<vmem>>, %arg2: memref<4x1xf32, #tpu.memory_space<vmem>>, %arg3: memref<4x1xf32, #tpu.memory_space<vmem>>, %arg4: memref<4x1xf32, #tpu.memory_space<vmem>>, %arg5: memref<4x1xf32, #tpu.memory_space<vmem>>, %arg6: memref<2x4x256xf32, #tpu.memory_space<vmem>>, %arg7: memref<4x1xf32, #tpu.memory_space<vmem>>, %arg8: memref<4x1xf32, #tpu.memory_space<vmem>>) attributes {dimension_semantics = [#tpu.dimension_semantics<arbitrary>], iteration_bounds = array<i64: 1>, scalar_prefetch = 0 : i64, scratch_operands = 0 : i64, tpu.core_type = #tpu.core_type<tc>, window_params = [{pipeline_mode = #tpu.pipeline_mode<synchronous>, transform_indices = @transform_0, window_bounds = array<i64: 2, 4, 256>}, {pipeline_mode = #tpu.pipeline_mode<synchronous>, transform_indices = @transform_1, window_bounds = array<i64: 4, 1>}, {pipeline_mode = #tpu.pipeline_mode<synchronous>, transform_indices = @transform_2, window_bounds = array<i64: 4, 1>}, {pipeline_mode = #tpu.pipeline_mode<synchronous>, transform_indices = @transform_3, window_bounds = array<i64: 4, 1>}, {pipeline_mode = #tpu.pipeline_mode<synchronous>, transform_indices = @transform_4, window_bounds = array<i64: 4, 1>}, {pipeline_mode = #tpu.pipeline_mode<synchronous>, transform_indices = @transform_5, window_bounds = array<i64: 2, 4, 256>}, {pipeline_mode = #tpu.pipeline_mode<synchronous>, transform_indices = @transform_6, window_bounds = array<i64: 4, 1>}, {pipeline_mode = #tpu.pipeline_mode<synchronous>, transform_indices = @transform_7, window_bounds = array<i64: 4, 1>}]} {
    %c0 = arith.constant 0 : index
    %c0_0 = arith.constant 0 : index
    %c0_1 = arith.constant 0 : index
    %0 = vector.load %arg1[%c0, %c0_0, %c0_1] : memref<2x4x256xf32, #tpu.memory_space<vmem>>, vector<2x4x256xf32>
    %cst = arith.constant dense<0.000000e+00> : vector<4x256xf32>
    %1 = vector.multi_reduction <add>, %0, %cst [0] : vector<2x4x256xf32> to vector<4x256xf32>
    %cst_2 = arith.constant dense<0.000000e+00> : vector<4xf32>
    %2 = vector.multi_reduction <add>, %1, %cst_2 [1] : vector<4x256xf32> to vector<4xf32>
    %3 = vector.shape_cast %2 : vector<4xf32> to vector<4x1xf32>
    %cst_3 = arith.constant 0.001953125 : f32
    %4 = vector.broadcast %cst_3 : f32 to vector<4x1xf32>
    %5 = arith.mulf %3, %4 : vector<4x1xf32>
    %6 = vector.shape_cast %5 : vector<4x1xf32> to vector<1x4x1xf32>
    %7 = vector.broadcast %6 : vector<1x4x1xf32> to vector<2x4x256xf32>
    %8 = arith.subf %0, %7 : vector<2x4x256xf32>
    %9 = arith.mulf %8, %8 : vector<2x4x256xf32>
    %cst_4 = arith.constant dense<0.000000e+00> : vector<4x256xf32>
    %10 = vector.multi_reduction <add>, %9, %cst_4 [0] : vector<2x4x256xf32> to vector<4x256xf32>
    %cst_5 = arith.constant dense<0.000000e+00> : vector<4xf32>
    %11 = vector.multi_reduction <add>, %10, %cst_5 [1] : vector<4x256xf32> to vector<4xf32>
    %12 = vector.shape_cast %11 : vector<4xf32> to vector<4x1xf32>
    %cst_6 = arith.constant 0.00195694715 : f32
    %13 = vector.broadcast %cst_6 : f32 to vector<4x1xf32>
    %14 = arith.mulf %12, %13 : vector<4x1xf32>
    %c0_7 = arith.constant 0 : index
    %c0_8 = arith.constant 0 : index
    %15 = vector.load %arg2[%c0_7, %c0_8] : memref<4x1xf32, #tpu.memory_space<vmem>>, vector<4x1xf32>
    %c0_9 = arith.constant 0 : index
    %c0_10 = arith.constant 0 : index
    %16 = vector.load %arg2[%c0_9, %c0_10] : memref<4x1xf32, #tpu.memory_space<vmem>>, vector<4x1xf32>
    %17 = arith.subf %5, %16 : vector<4x1xf32>
    %cst_11 = arith.constant 1.000000e+00 : f32
    %18 = vector.broadcast %cst_11 : f32 to vector<4x1xf32>
    %19 = arith.mulf %17, %18 : vector<4x1xf32>
    %20 = arith.addf %15, %19 : vector<4x1xf32>
    %c0_12 = arith.constant 0 : index
    %c0_13 = arith.constant 0 : index
    %21 = vector.load %arg3[%c0_12, %c0_13] : memref<4x1xf32, #tpu.memory_space<vmem>>, vector<4x1xf32>
    %c0_14 = arith.constant 0 : index
    %c0_15 = arith.constant 0 : index
    %22 = vector.load %arg3[%c0_14, %c0_15] : memref<4x1xf32, #tpu.memory_space<vmem>>, vector<4x1xf32>
    %23 = arith.subf %14, %22 : vector<4x1xf32>
    %cst_16 = arith.constant 1.000000e+00 : f32
    %24 = vector.broadcast %cst_16 : f32 to vector<4x1xf32>
    %25 = arith.mulf %23, %24 : vector<4x1xf32>
    %26 = arith.addf %21, %25 : vector<4x1xf32>
    %c0_17 = arith.constant 0 : index
    %c0_18 = arith.constant 0 : index
    %27 = vector.load %arg7[%c0_17, %c0_18] : memref<4x1xf32, #tpu.memory_space<vmem>>, vector<4x1xf32>
    tpu.vector_store %arg7[%c0_17, %c0_18], %20 {strides = array<i32>} : memref<4x1xf32, #tpu.memory_space<vmem>>, vector<4x1xf32>,
    %c0_19 = arith.constant 0 : index
    %c0_20 = arith.constant 0 : index
    %28 = vector.load %arg8[%c0_19, %c0_20] : memref<4x1xf32, #tpu.memory_space<vmem>>, vector<4x1xf32>
    tpu.vector_store %arg8[%c0_19, %c0_20], %26 {strides = array<i32>} : memref<4x1xf32, #tpu.memory_space<vmem>>, vector<4x1xf32>,
    %c0_21 = arith.constant 0 : index
    %c0_22 = arith.constant 0 : index
    %29 = vector.load %arg4[%c0_21, %c0_22] : memref<4x1xf32, #tpu.memory_space<vmem>>, vector<4x1xf32>
    %cst_23 = arith.constant 9.99999974E-6 : f32
    %30 = vector.broadcast %cst_23 : f32 to vector<4x1xf32>
    %31 = arith.addf %26, %30 : vector<4x1xf32>
    %32 = math.rsqrt %31 : vector<4x1xf32>
    %33 = arith.mulf %29, %32 : vector<4x1xf32>
    %c0_24 = arith.constant 0 : index
    %c0_25 = arith.constant 0 : index
    %34 = vector.load %arg5[%c0_24, %c0_25] : memref<4x1xf32, #tpu.memory_space<vmem>>, vector<4x1xf32>
    %35 = arith.mulf %20, %33 : vector<4x1xf32>
    %36 = arith.subf %34, %35 : vector<4x1xf32>
    %37 = vector.shape_cast %33 : vector<4x1xf32> to vector<1x4x1xf32>
    %38 = vector.broadcast %37 : vector<1x4x1xf32> to vector<2x4x256xf32>
    %39 = arith.mulf %0, %38 : vector<2x4x256xf32>
    %40 = vector.shape_cast %36 : vector<4x1xf32> to vector<1x4x1xf32>
    %41 = vector.broadcast %40 : vector<1x4x1xf32> to vector<2x4x256xf32>
    %42 = arith.addf %39, %41 : vector<2x4x256xf32>
    %c0_26 = arith.constant 0 : index
    %c0_27 = arith.constant 0 : index
    %c0_28 = arith.constant 0 : index
    %43 = vector.load %arg6[%c0_26, %c0_27, %c0_28] : memref<2x4x256xf32, #tpu.memory_space<vmem>>, vector<2x4x256xf32>
    tpu.vector_store %arg6[%c0_26, %c0_27, %c0_28], %42 {strides = array<i32>} : memref<2x4x256xf32, #tpu.memory_space<vmem>>, vector<2x4x256xf32>,
    return
  }
  func.func @transform_0(%arg0: i32) -> (i32, i32, i32) {
    %c0_i32 = arith.constant 0 : i32
    %c0_i32_0 = arith.constant 0 : i32
    %c0_i32_1 = arith.constant 0 : i32
    %c0_i32_2 = arith.constant 0 : i32
    return %c0_i32, %c0_i32_0, %c0_i32_1 : i32, i32, i32
  }
  func.func @transform_1(%arg0: i32) -> (i32, i32) {
    %c0_i32 = arith.constant 0 : i32
    %c0_i32_0 = arith.constant 0 : i32
    %c0_i32_1 = arith.constant 0 : i32
    return %c0_i32, %c0_i32_0 : i32, i32
  }
  func.func @transform_2(%arg0: i32) -> (i32, i32) {
    %c0_i32 = arith.constant 0 : i32
    %c0_i32_0 = arith.constant 0 : i32
    %c0_i32_1 = arith.constant 0 : i32
    return %c0_i32, %c0_i32_0 : i32, i32
  }
  func.func @transform_3(%arg0: i32) -> (i32, i32) {
    %c0_i32 = arith.constant 0 : i32
    %c0_i32_0 = arith.constant 0 : i32
    %c0_i32_1 = arith.constant 0 : i32
    return %c0_i32, %c0_i32_0 : i32, i32
  }
  func.func @transform_4(%arg0: i32) -> (i32, i32) {
    %c0_i32 = arith.constant 0 : i32
    %c0_i32_0 = arith.constant 0 : i32
    %c0_i32_1 = arith.constant 0 : i32
    return %c0_i32, %c0_i32_0 : i32, i32
  }
  func.func @transform_5(%arg0: i32) -> (i32, i32, i32) {
    %c0_i32 = arith.constant 0 : i32
    %c0_i32_0 = arith.constant 0 : i32
    %c0_i32_1 = arith.constant 0 : i32
    %c0_i32_2 = arith.constant 0 : i32
    return %c0_i32, %c0_i32_0, %c0_i32_1 : i32, i32, i32
  }
  func.func @transform_6(%arg0: i32) -> (i32, i32) {
    %c0_i32 = arith.constant 0 : i32
    %c0_i32_0 = arith.constant 0 : i32
    %c0_i32_1 = arith.constant 0 : i32
    return %c0_i32, %c0_i32_0 : i32, i32
  }
  func.func @transform_7(%arg0: i32) -> (i32, i32) {
    %c0_i32 = arith.constant 0 : i32
    %c0_i32_0 = arith.constant 0 : i32
    %c0_i32_1 = arith.constant 0 : i32
    return %c0_i32, %c0_i32_0 : i32, i32
  }
}

</mosaic_0001>

<bundles_post_ra>
// kernel: tpu_custom_call.1
= control target key start
LH: loop header
LB: loop body
LE: loop exit
PB: predicated region body
PF: predicated region fallthrough
CT: control target
= control target key end

     0   :  { %13 = vsyncpa [#allocation3], 0  ;;  %s341_s0 = inlined_call_operand.hbm [shape: f32[2,4,256], index: 0, kind: input, shape index: {}]   ;;  %s342_s1 = inlined_call_operand.vmem [shape: f32[4,1], index: 1, kind: input, shape index: {}]   ;;  %s343_s2 = inlined_call_operand.vmem [shape: f32[4,1], index: 2, kind: input, shape index: {}]   ;;  %s344_s3 = inlined_call_operand.vmem [shape: f32[4,1], index: 3, kind: input, shape index: {}]   ;;  %s345_s4 = inlined_call_operand.vmem [shape: f32[4,1], index: 4, kind: input, shape index: {}]   ;;  %s346_s5 = inlined_call_operand.hbm [shape: f32[2,4,256], index: 5, kind: output, shape index: {0}]   ;;  %s347_s6 = inlined_call_operand.vmem [shape: f32[4,1], index: 6, kind: output, shape index: {1}]   ;;  %s348_s7 = inlined_call_operand.vmem [shape: f32[4,1], index: 7, kind: output, shape index: {2}]  }
   0x1   :  { %14 = vsyncpa [#allocation4], 0  ;;  %s19_s26 = sshll.u32 %s341_s0, 4  ;;  %s241_s27 = smov [#allocation2]   ;;  %s20_s26 = int_to_ptr.hbm [resolvable:$true] %s19_s26 }
   0x2   :  { %s21_s28 = sshll.u32 %s241_s27, 4  ;;  %s242_s29 = smov 128   ;;  %s22_s28 = int_to_ptr.vmem [resolvable:$true] %s21_s28 }
   0x3   :  { %s243_s30 = smov 8  }
   0x4   :  { %27 = dma.hbm_to_vmem [thread:$0]  %s20_s26, 256, %s22_s28, [#allocation3], %s242_s29, %s242_s29, %s243_s30  }
   0x5   :  { %237 = dma.done.wait [#allocation3], 256  }
   0x6   :  { %238 = vsyncadd [#allocation3], 4294967040  ;;  %v293_v0 = vld [vmem:[#allocation2] sm:$0xff]  ;;  %v295_v1 = vld [vmem:[#allocation2 + $0x8] sm:$0xff]  ;;  %vm55_vm0 = vcmask 1043456   ;;  %vm109_vm1 = vcmask 3072  }
   0x7   :  { %44 = vst [vmem:[#allocation1] ss:$2 sm:$0xff] %v293_v0  ;;  %v244_v15 = vmov 839922192   ;;  %v103_v18 = vld [vmem:[%s342_s1] sm:$0xf] }
   0x8   :  { %48 = vst [vmem:[#allocation1 + $0x10] ss:$2 sm:$0xff] %v295_v1  ;;  %v70_v16 = vunpack.c.l.s4 %v244_v15  ;;  %v245_v41 = vmov 0   ;;  %v106_v42 = vld [vmem:[%s343_s2] sm:$0xf]  ;;  %s158_s18 = sshll.u32 %s346_s5, 4  ;;  %s159_s18 = int_to_ptr.hbm [resolvable:$true] %s158_s18 }
   0x9   :  { %185 = vset.pattern.permute.xlu1 %v245_v41  ;;  %186 = vset.pattern.permute.xlu0 %v245_v41  ;;  %v112_v53 = vld [vmem:[%s344_s3] sm:$0xf]  ;;  %s246_s3 = smov [#allocation5]  }
   0xa   :  { %v71_v17 = vunpack.c.0.s8 %v70_v16  ;;  %v125_v58 = vld [vmem:[%s345_s4] sm:$0xf]  ;;  %s156_s15 = sshll.u32 %s246_s3, 4  ;;  %s157_s15 = int_to_ptr.vmem [resolvable:$true] %s156_s15 }
   0xe   :  { %v45_v2 = vld.sshfl [vmem:[#allocation1] sm:$0xff pattern:$0x75316420]  ;;  %v46_v3 = vld.sshfl [vmem:[#allocation1 + $0x8] sm:$0xff pattern:$0x75316420] }
   0xf   :  { %v49_v4 = vld.sshfl [vmem:[#allocation1 + $0x10] sm:$0xff pattern:$0x75316420]  ;;  %v50_v5 = vld.sshfl [vmem:[#allocation1 + $0x18] sm:$0xff pattern:$0x75316420] }
  0x10   :  { %v56_v6 = vsel %vm55_vm0, %v45_v2, 0.0  ;;  %v57_v7 = vsel %vm55_vm0, %v49_v4, 0.0  ;;  %v59_v8 = vsel %vm55_vm0, %v46_v3, 0.0  ;;  %v60_v9 = vsel %vm55_vm0, %v50_v5, 0.0 }
  0x11   :  { %v58_v10 = vadd.f32 %v57_v7, %v56_v6  ;;  %v61_v11 = vadd.f32 %v60_v9, %v59_v8 }
  0x13   :  { %v62_v12 = vsel %vm55_vm0, %v58_v10, 0.0  ;;  %v63_v13 = vsel %vm55_vm0, %v61_v11, 0.0 }
  0x14   :  { %v64_v14 = vadd.f32 %v63_v13, %v62_v12 }
  0x16   :  { %65 = vadd.xlane.f32.xlu0 %v64_v14 }
  0x89   :  { %v66_v19 = vpop.xlane.xlu0 %65 }
  0x8a   :  { %v67_v20 = vmul.f32 0.001953125, %v66_v19 }
  0x8c   :  { %v72_v21 = vperm.slane %v67_v20, %v71_v17  ;;  %v104_v22 = vsub.f32 %v67_v20, %v103_v18 }
  0x8e   :  { %v74_v23 = vsub.f32 %v293_v0, %v72_v21  ;;  %v75_v24 = vsub.f32 %v295_v1, %v72_v21  ;;  %v105_v25 = vadd.f32 %v104_v22, %v103_v18 }
  0x90   :  { %v76_v26 = vmul.f32 %v74_v23, %v74_v23  ;;  %v77_v27 = vmul.f32 %v75_v24, %v75_v24  ;;  %110 = vst.msk [vmem:[%s347_s6] sm:$0xf] %vm109_vm1, %v105_v25 }
  0x92   :  { %80 = vst [vmem:[#allocation1] ss:$2 sm:$0xff] %v76_v26 }
  0x93   :  { %84 = vst [vmem:[#allocation1 + $0x10] ss:$2 sm:$0xff] %v77_v27 }
  0x99   :  { %v81_v28 = vld.sshfl [vmem:[#allocation1] sm:$0xff pattern:$0x75316420]  ;;  %v82_v29 = vld.sshfl [vmem:[#allocation1 + $0x8] sm:$0xff pattern:$0x75316420] }
  0x9a   :  { %v85_v30 = vld.sshfl [vmem:[#allocation1 + $0x10] sm:$0xff pattern:$0x75316420]  ;;  %v86_v31 = vld.sshfl [vmem:[#allocation1 + $0x18] sm:$0xff pattern:$0x75316420] }
  0x9b   :  { %v91_v32 = vsel %vm55_vm0, %v81_v28, 0.0  ;;  %v92_v33 = vsel %vm55_vm0, %v85_v30, 0.0  ;;  %v94_v34 = vsel %vm55_vm0, %v82_v29, 0.0  ;;  %v95_v35 = vsel %vm55_vm0, %v86_v31, 0.0 }
  0x9c   :  { %v93_v36 = vadd.f32 %v92_v33, %v91_v32  ;;  %v96_v37 = vadd.f32 %v95_v35, %v94_v34 }
  0x9e   :  { %v97_v38 = vsel %vm55_vm0, %v93_v36, 0.0  ;;  %v98_v39 = vsel %vm55_vm0, %v96_v37, 0.0 }
  0x9f   :  { %v99_v40 = vadd.f32 %v98_v39, %v97_v38 }
  0xa1   :  { %100 = vadd.xlane.f32.xlu0 %v99_v40 }
 0x114   :  { %v101_v43 = vpop.xlane.xlu0 %100 }
 0x115   :  { %v102_v44 = vmul.f32 0.0019569471, %v101_v43 }
 0x117   :  { %v107_v45 = vsub.f32 %v102_v44, %v106_v42 }
 0x119   :  { %v108_v46 = vadd.f32 %v107_v45, %v106_v42 }
 0x11b   :  { %111 = vst.msk [vmem:[%s348_s7] sm:$0xf] %vm109_vm1, %v108_v46  ;;  %v113_v47 = vadd.f32 1e-05, %v108_v46 }
 0x11d   :  { %187 = vrsqrt.f32 %v113_v47  ;;  %vm120_vm3 = vweird.f32 %v113_v47 }
 0x123   :  { %v188_v48 = vpop.eup %187 }
 0x124   :  { %v115_v49 = vmul.f32 %v188_v48, %v113_v47  ;;  %vm121_vm2 = vweird.f32 %v188_v48 }
 0x125   :  { %vm122_vm4 = vmor %vm120_vm3, %vm121_vm2 }
 0x126   :  { %v116_v50 = vmul.f32 %v188_v48, %v115_v49 }
 0x128   :  { %v117_v51 = vmul.f32 0.5, %v116_v50 }
 0x12a   :  { %v118_v52 = vsub.f32 1.5, %v117_v51 }
 0x12c   :  { %v119_v54 = vmul.f32 %v188_v48, %v118_v52 }
 0x12e   :  { %v123_v55 = vsel %vm122_vm4, %v188_v48, %v119_v54 }
 0x12f   :  { %v124_v56 = vmul.f32 %v123_v55, %v112_v53 }
 0x131   :  { %130 = vperm.xlu1 %185, %v124_v56   ;;  %v126_v57 = vmul.f32 %v124_v56, %v105_v25 }
 0x133   :  { %v127_v59 = vsub.f32 %v125_v58, %v126_v57 }
 0x139   :  { %141 = vperm.xlu1 %185, %v127_v59  }
 0x1a3   :  { %v131_v60 = vpop.permute.xlu1 %130 }
 0x1a4   :  { %v135_v61 = vperm.slane %v131_v60, %v71_v17 }
 0x1a6   :  { %v137_v63 = vmul.f32 %v135_v61, %v293_v0  ;;  %v138_v2 = vmul.f32 %v135_v61, %v295_v1 }
 0x1ab   :  { %v142_v62 = vpop.permute.xlu1 %141 }
 0x1ac   :  { %v146_v3 = vperm.slane %v142_v62, %v71_v17 }
 0x1ae   :  { %v148_v4 = vadd.f32 %v146_v3, %v137_v63  ;;  %v149_v5 = vadd.f32 %v146_v3, %v138_v2 }
 0x1b0   :  { %150 = vst [vmem:[#allocation5] sm:$0xff] %v148_v4 }
 0x1b1   :  { %151 = vst [vmem:[#allocation5 + $0x8] sm:$0xff] %v149_v5 }
 0x1b2   :  { %164 = dma.vmem_to_hbm [thread:$0]  %s157_s15, 256, %s159_s18, [#allocation4], %s242_s29, %s242_s29, %s243_s30  }
 0x1b3   :  { %239 = dma.done.wait [#allocation4], 256  }
 0x1b4   :  { %240 = vsyncadd [#allocation4], 4294967040 }
 0x1b5   :  { %177 = vsyncpa [#allocation3], 1 }
 0x1b6   :  { %178 = vsyncpa [#allocation4], 1 }

</bundles_post_ra>
